<compile_context>
chip_gen: v6e
topology: v6e:2x2x1
jax: 0.10.0
libtpu: 0.0.40
codegen_flags: <defaults>
</compile_context>

<pallas_src>
import functools

import jax
import jax.numpy as jnp
from jax.experimental import pallas as pl
from jax.experimental.pallas import tpu as pltpu


def _make_kernel(*, nk, size, stride, seq_len, out_len, tile_c, kb, n_k_blocks):
    inv_n = 1.0 / float(size)
    inv_nm1 = 1.0 / float(size - 1)

    def kernel(*refs):
        x_refs = refs[:nk]          # nk views of the same (rows, S) array
        o_ref = refs[nk]
        j = pl.program_id(1)        # output-column tile index
        tr = x_refs[0].shape[0]     # rows in this tile (static)

        # Per-output-column window metadata for this column tile.
        cols = j * tile_c + jax.lax.broadcasted_iota(jnp.int32, (1, tile_c), 1)
        win_lo = cols * stride
        win_hi = win_lo + size
        col_ok = cols < out_len

        p_base = jax.lax.broadcasted_iota(jnp.int32, (kb, 1), 0)   # W row offsets
        v_base = jax.lax.broadcasted_iota(jnp.int32, (1, kb), 1)   # x lane offsets

        s1 = jnp.zeros((tr, tile_c), jnp.float32)
        s2 = jnp.zeros((tr, tile_c), jnp.float32)
        mu = None
        for t in range(nk):
            nominal = j * stride + t                         # nominal K block
            actual = jnp.minimum(nominal, n_k_blocks - 1)    # must match index_map
            start = actual * kb                              # element offset of block
            not_clamped = nominal == actual                  # clamped block contributes 0

            x = x_refs[t][...]                               # (tr, kb) f32
            valid = (start + v_base) < seq_len               # mask ragged K garbage
            if t == 0:
                # Per-row centering constant (exact for stddev by translation
                # invariance); masked mean of the first K block keeps the
                # one-pass formula well-conditioned on the bf16 path.
                cnt = jnp.maximum(jnp.minimum(seq_len - start, kb), 1)
                mu = jnp.sum(jnp.where(valid, x, 0.0), axis=-1, keepdims=True)
                mu = mu / cnt.astype(jnp.float32)
            xc = jnp.where(valid, x - mu, 0.0)               # zero OOB lanes (NaN-safe)

            # Window/band selection tile, generated in-kernel (0/1 exact in bf16).
            p = start + p_base                               # (kb, 1) seq position
            w = ((p >= win_lo) & (p < win_hi) & col_ok & not_clamped
                 ).astype(jnp.bfloat16)                      # (kb, tile_c)

            # hi/lo split -> bf16 MXU matmuls with ~f32 end-to-end accuracy.
            x_hi = xc.astype(jnp.bfloat16)
            x_lo = (xc - x_hi.astype(jnp.float32)).astype(jnp.bfloat16)
            y = xc * xc
            y_hi = y.astype(jnp.bfloat16)
            y_lo = (y - y_hi.astype(jnp.float32)).astype(jnp.bfloat16)

            dot = functools.partial(jnp.dot, preferred_element_type=jnp.float32)
            s1 = s1 + dot(x_hi, w) + dot(x_lo, w)            # window sums
            s2 = s2 + dot(y_hi, w) + dot(y_lo, w)            # window sums of squares

        var = (s2 - s1 * s1 * inv_n) * inv_nm1
        o_ref[...] = jnp.sqrt(jnp.maximum(var, 0.0)).astype(o_ref.dtype)

    return kernel


def ts_stddev(x, size=20, stride=1, *, tile_r=256, tile_c=256):
    """Pallas TPU implementation of TsStddev.forward (x: (B, F, S) float)."""
    b, f, s = x.shape
    out_len = (s - size) // stride + 1
    rows = b * f
    x2d = x.reshape(rows, s).astype(jnp.float32)

    # Lane-dense output, padded to a multiple of tile_c (256 fills MXU N).
    n_col_tiles = pl.cdiv(out_len, tile_c)
    out_p = n_col_tiles * tile_c

    # K-block layout.  tile_c == kb makes the band start of column tile j land
    # exactly at block index j*stride, so the band is covered by blocks
    # [j*stride, j*stride + nk).
    if s <= tile_c:
        kb, n_k_blocks, nk = s, 1, 1        # single full-row contraction block
    else:
        kb = tile_c
        n_k_blocks = pl.cdiv(s, kb)
        band = (tile_c - 1) * stride + size
        nk = min(pl.cdiv(band, kb), n_k_blocks)

    tr = rows if rows <= tile_r else tile_r  # full-dim block when rows are small
    grid = (pl.cdiv(rows, tr), n_col_tiles)  # no wrapper-side padding of rows

    kmax = n_k_blocks - 1
    in_specs = [
        pl.BlockSpec((tr, kb),
                     (lambda i, j, t=t: (i, jnp.minimum(j * stride + t, kmax))))
        for t in range(nk)
    ]
    out_specs = pl.BlockSpec((tr, tile_c), lambda i, j: (i, j))

    kernel = _make_kernel(nk=nk, size=size, stride=stride, seq_len=s,
                          out_len=out_len, tile_c=tile_c, kb=kb,
                          n_k_blocks=n_k_blocks)

    out = pl.pallas_call(
        kernel,
        out_shape=jax.ShapeDtypeStruct((rows, out_p), jnp.float32),
        grid_spec=pl.GridSpec(grid=grid, in_specs=in_specs, out_specs=out_specs),
        compiler_params=pltpu.CompilerParams(
            dimension_semantics=("parallel", "parallel"),
            vmem_limit_bytes=48 * 1024 * 1024,
        ),
    )(*([x2d] * nk))

    return out[:, :out_len].reshape(b, f, out_len)


def _reference(x, size=20, stride=1):
    # Pure-JAX reference mirroring the PyTorch loop semantics (two-pass).
    b, f, s = x.shape
    out_len = (s - size) // stride + 1
    cols = []
    for t in range(out_len):
        seg = x[:, :, t * stride:t * stride + size]
        mean = jnp.mean(seg, axis=-1, keepdims=True)
        c = seg - mean
        cols.append(jnp.sqrt(jnp.sum(c * c, axis=-1) / (size - 1)))
    return jnp.stack(cols, axis=-1)


if __name__ == "__main__":
    key = jax.random.PRNGKey(0)

    # Module defaults on a small shape: size=20, stride=1.
    batch, feats, seq = 2, 4, 32
    x = jax.random.normal(key, (batch, feats, seq), dtype=jnp.float32)
    out = jax.block_until_ready(ts_stddev(x, size=20, stride=1))
    ref = _reference(x, size=20, stride=1)
    assert out.shape == ref.shape, (out.shape, ref.shape)
    assert jnp.allclose(out, ref, atol=1e-4, rtol=1e-4), "mismatch vs reference"

    # Non-unit stride exercises the window/band mask.
    out2 = jax.block_until_ready(ts_stddev(x, size=20, stride=2))
    ref2 = _reference(x, size=20, stride=2)
    assert out2.shape == ref2.shape, (out2.shape, ref2.shape)
    assert jnp.allclose(out2, ref2, atol=1e-4, rtol=1e-4), "mismatch (stride=2)"

    # Longer sequence exercises multiple output-column tiles, multiple K blocks
    # and the clamped (no-op) K block on the last column tile.
    x3 = jax.random.normal(jax.random.PRNGKey(0), (2, 4, 768), dtype=jnp.float32)
    out3 = jax.block_until_ready(ts_stddev(x3, size=20, stride=1))
    ref3 = _reference(x3, size=20, stride=1)
    assert out3.shape == ref3.shape, (out3.shape, ref3.shape)
    assert jnp.allclose(out3, ref3, atol=1e-4, rtol=1e-4), "mismatch (long seq)"

    print("KERNEL_OK")
</pallas_src>

<mosaic_0001>
module attributes {stable_mosaic.version = 11 : i64} {
  func.func @kernel(%arg0: i32, %arg1: i32, %arg2: memref<8x32xf32, #tpu.memory_space<vmem>>, %arg3: memref<8x256xf32, #tpu.memory_space<vmem>>) attributes {dimension_semantics = [#tpu.dimension_semantics<parallel>, #tpu.dimension_semantics<parallel>], iteration_bounds = array<i64: 1, 1>, scalar_prefetch = 0 : i64, scratch_operands = 0 : i64, tpu.core_type = #tpu.core_type<tc>, window_params = [{transform_indices = @transform_0, window_bounds = array<i64: 8, 32>}, {transform_indices = @transform_1, window_bounds = array<i64: 8, 256>}]} {
    %c256_i32 = arith.constant 256 : i32
    %0 = arith.muli %arg1, %c256_i32 : i32
    %1 = tpu.iota {dimensions = array<i32: 1>} : vector<1x256xi32>
    %2 = vector.broadcast %0 : i32 to vector<1x256xi32>
    %3 = arith.addi %2, %1 : vector<1x256xi32>
    %c1_i32 = arith.constant 1 : i32
    %4 = vector.broadcast %c1_i32 : i32 to vector<1x256xi32>
    %5 = arith.muli %3, %4 : vector<1x256xi32>
    %c20_i32 = arith.constant 20 : i32
    %6 = vector.broadcast %c20_i32 : i32 to vector<1x256xi32>
    %7 = arith.addi %5, %6 : vector<1x256xi32>
    %c13_i32 = arith.constant 13 : i32
    %8 = vector.broadcast %c13_i32 : i32 to vector<1x256xi32>
    %9 = arith.cmpi slt, %3, %8 : vector<1x256xi32>
    %10 = tpu.iota {dimensions = array<i32: 0>} : vector<32x1xi32>
    %11 = tpu.iota {dimensions = array<i32: 1>} : vector<1x32xi32>
    %cst = arith.constant 0.000000e+00 : f32
    %12 = vector.broadcast %cst : f32 to vector<8x256xf32>
    %cst_0 = arith.constant 0.000000e+00 : f32
    %13 = vector.broadcast %cst_0 : f32 to vector<8x256xf32>
    %c1_i32_1 = arith.constant 1 : i32
    %14 = arith.muli %arg1, %c1_i32_1 : i32
    %c0_i32 = arith.constant 0 : i32
    %15 = arith.addi %14, %c0_i32 : i32
    %c0_i32_2 = arith.constant 0 : i32
    %16 = arith.minsi %15, %c0_i32_2 : i32
    %c32_i32 = arith.constant 32 : i32
    %17 = arith.muli %16, %c32_i32 : i32
    %18 = arith.cmpi eq, %15, %16 : i32
    %c0 = arith.constant 0 : index
    %c0_3 = arith.constant 0 : index
    %19 = vector.load %arg2[%c0, %c0_3] : memref<8x32xf32, #tpu.memory_space<vmem>>, vector<8x32xf32>
    %20 = vector.broadcast %17 : i32 to vector<1x32xi32>
    %21 = arith.addi %20, %11 : vector<1x32xi32>
    %c32_i32_4 = arith.constant 32 : i32
    %22 = vector.broadcast %c32_i32_4 : i32 to vector<1x32xi32>
    %23 = arith.cmpi slt, %21, %22 : vector<1x32xi32>
    %c32_i32_5 = arith.constant 32 : i32
    %24 = arith.subi %c32_i32_5, %17 : i32
    %c32_i32_6 = arith.constant 32 : i32
    %25 = arith.minsi %24, %c32_i32_6 : i32
    %c1_i32_7 = arith.constant 1 : i32
    %26 = arith.maxsi %25, %c1_i32_7 : i32
    %cst_8 = arith.constant 0.000000e+00 : f32
    %27 = vector.shape_cast %23 : vector<1x32xi1> to vector<1x32xi1>
    %28 = vector.broadcast %27 : vector<1x32xi1> to vector<8x32xi1>
    %29 = vector.broadcast %cst_8 : f32 to vector<8x32xf32>
    %30 = arith.select %28, %19, %29 : vector<8x32xi1>, vector<8x32xf32>
    %cst_9 = arith.constant dense<0.000000e+00> : vector<8xf32>
    %31 = vector.multi_reduction <add>, %30, %cst_9 [1] : vector<8x32xf32> to vector<8xf32>
    %32 = vector.shape_cast %31 : vector<8xf32> to vector<8x1xf32>
    %33 = arith.sitofp %26 : i32 to f32
    %34 = vector.broadcast %33 : f32 to vector<8x1xf32>
    %35 = arith.divf %32, %34 : vector<8x1xf32>
    %36 = vector.broadcast %35 : vector<8x1xf32> to vector<8x32xf32>
    %37 = arith.subf %19, %36 : vector<8x32xf32>
    %cst_10 = arith.constant 0.000000e+00 : f32
    %38 = vector.shape_cast %23 : vector<1x32xi1> to vector<1x32xi1>
    %39 = vector.broadcast %38 : vector<1x32xi1> to vector<8x32xi1>
    %40 = vector.broadcast %cst_10 : f32 to vector<8x32xf32>
    %41 = arith.select %39, %37, %40 : vector<8x32xi1>, vector<8x32xf32>
    %42 = vector.broadcast %17 : i32 to vector<32x1xi32>
    %43 = arith.addi %42, %10 : vector<32x1xi32>
    %44 = vector.broadcast %43 : vector<32x1xi32> to vector<32x256xi32>
    %45 = vector.broadcast %5 : vector<1x256xi32> to vector<32x256xi32>
    %46 = arith.cmpi sge, %44, %45 : vector<32x256xi32>
    %47 = vector.broadcast %43 : vector<32x1xi32> to vector<32x256xi32>
    %48 = vector.broadcast %7 : vector<1x256xi32> to vector<32x256xi32>
    %49 = arith.cmpi slt, %47, %48 : vector<32x256xi32>
    %50 = arith.andi %46, %49 : vector<32x256xi1>
    %51 = vector.broadcast %9 : vector<1x256xi1> to vector<32x256xi1>
    %52 = arith.andi %50, %51 : vector<32x256xi1>
    %53 = vector.broadcast %18 : i1 to vector<32x256xi1>
    %54 = arith.andi %52, %53 : vector<32x256xi1>
    %55 = arith.extui %54 : vector<32x256xi1> to vector<32x256xi32>
    %56 = arith.sitofp %55 : vector<32x256xi32> to vector<32x256xf32>
    %57 = arith.truncf %56 : vector<32x256xf32> to vector<32x256xbf16>
    %58 = arith.truncf %41 : vector<8x32xf32> to vector<8x32xbf16>
    %59 = arith.extf %58 : vector<8x32xbf16> to vector<8x32xf32>
    %60 = arith.subf %41, %59 : vector<8x32xf32>
    %61 = arith.truncf %60 : vector<8x32xf32> to vector<8x32xbf16>
    %62 = arith.mulf %41, %41 : vector<8x32xf32>
    %63 = arith.truncf %62 : vector<8x32xf32> to vector<8x32xbf16>
    %64 = arith.extf %63 : vector<8x32xbf16> to vector<8x32xf32>
    %65 = arith.subf %62, %64 : vector<8x32xf32>
    %66 = arith.truncf %65 : vector<8x32xf32> to vector<8x32xbf16>
    %cst_11 = arith.constant dense<0.000000e+00> : vector<8x256xf32>
    %67 = tpu.matmul %58, %57, %cst_11 {dimension_numbers = #tpu.dot_dimension_numbers<[1], [0], [0], [1], [0, 0, 1, 1], [], []>} : vector<8x32xbf16>, vector<32x256xbf16>, vector<8x256xf32> -> vector<8x256xf32>
    %68 = arith.addf %12, %67 : vector<8x256xf32>
    %cst_12 = arith.constant dense<0.000000e+00> : vector<8x256xf32>
    %69 = tpu.matmul %61, %57, %cst_12 {dimension_numbers = #tpu.dot_dimension_numbers<[1], [0], [0], [1], [0, 0, 1, 1], [], []>} : vector<8x32xbf16>, vector<32x256xbf16>, vector<8x256xf32> -> vector<8x256xf32>
    %70 = arith.addf %68, %69 : vector<8x256xf32>
    %cst_13 = arith.constant dense<0.000000e+00> : vector<8x256xf32>
    %71 = tpu.matmul %63, %57, %cst_13 {dimension_numbers = #tpu.dot_dimension_numbers<[1], [0], [0], [1], [0, 0, 1, 1], [], []>} : vector<8x32xbf16>, vector<32x256xbf16>, vector<8x256xf32> -> vector<8x256xf32>
    %72 = arith.addf %13, %71 : vector<8x256xf32>
    %cst_14 = arith.constant dense<0.000000e+00> : vector<8x256xf32>
    %73 = tpu.matmul %66, %57, %cst_14 {dimension_numbers = #tpu.dot_dimension_numbers<[1], [0], [0], [1], [0, 0, 1, 1], [], []>} : vector<8x32xbf16>, vector<32x256xbf16>, vector<8x256xf32> -> vector<8x256xf32>
    %74 = arith.addf %72, %73 : vector<8x256xf32>
    %75 = arith.mulf %70, %70 : vector<8x256xf32>
    %cst_15 = arith.constant 5.000000e-02 : f32
    %76 = vector.broadcast %cst_15 : f32 to vector<8x256xf32>
    %77 = arith.mulf %75, %76 : vector<8x256xf32>
    %78 = arith.subf %74, %77 : vector<8x256xf32>
    %cst_16 = arith.constant 0.0526315793 : f32
    %79 = vector.broadcast %cst_16 : f32 to vector<8x256xf32>
    %80 = arith.mulf %78, %79 : vector<8x256xf32>
    %cst_17 = arith.constant 0.000000e+00 : f32
    %81 = vector.broadcast %cst_17 : f32 to vector<8x256xf32>
    %82 = arith.maximumf %80, %81 : vector<8x256xf32>
    %83 = math.sqrt %82 : vector<8x256xf32>
    %c0_18 = arith.constant 0 : index
    %c0_19 = arith.constant 0 : index
    %84 = vector.load %arg3[%c0_18, %c0_19] : memref<8x256xf32, #tpu.memory_space<vmem>>, vector<8x256xf32>
    tpu.vector_store %arg3[%c0_18, %c0_19], %83 {strides = array<i32>} : memref<8x256xf32, #tpu.memory_space<vmem>>, vector<8x256xf32>,
    return
  }
  func.func @transform_0(%arg0: i32, %arg1: i32) -> (i32, i32) {
    %c1_i32 = arith.constant 1 : i32
    %0 = arith.muli %arg1, %c1_i32 : i32
    %c0_i32 = arith.constant 0 : i32
    %1 = arith.addi %0, %c0_i32 : i32
    %c0_i32_0 = arith.constant 0 : i32
    %2 = arith.minsi %1, %c0_i32_0 : i32
    %c0_i32_1 = arith.constant 0 : i32
    return %arg0, %2 : i32, i32
  }
  func.func @transform_1(%arg0: i32, %arg1: i32) -> (i32, i32) {
    %c0_i32 = arith.constant 0 : i32
    return %arg0, %arg1 : i32, i32
  }
}

</mosaic_0001>

<bundles_post_ra>
// kernel: tpu_custom_call.1
= control target key start
LH: loop header
LB: loop body
LE: loop exit
PB: predicated region body
PF: predicated region fallthrough
CT: control target
= control target key end

     0   :  { %6 = vsyncpa [#allocation3], 0  ;;  %s538_s0 = inlined_call_operand.hbm [shape: f32[8,32], index: 0, kind: input, shape index: {}]   ;;  %s539_s1 = inlined_call_operand.hbm [shape: f32[8,256], index: 1, kind: output, shape index: {}]  }
   0x1   :  { %7 = vsyncpa [#allocation4], 0  ;;  %s478_s6 = smov [#allocation2]  }
   0x2   :  { %s14_s7 = sshll.u32 %s478_s6, 4  ;;  %s15_s7 = int_to_ptr.vmem [resolvable:$true] %s14_s7 }
   0x3   :  { %s442_s8 = scalar_lea.vmem %s15_s7, 128  ;;  %p447_p1 = scmp.lt.s32.totalorder %s15_s7, %s15_s7 }
   0x4   :  { %p443_p0 = scmp.ne.s32.totalorder %s15_s7, %s442_s8  ;;  %p448_p2 = scmp.lt.s32.totalorder %s442_s8, %s442_s8 }
   0x6   :  { %p449_p3 = por %p448_p2, %p447_p1 }
   0x8   :  { %p450_p4 = pnand %p449_p3, %p443_p0 }
   0xa   :  { %453 = shalt.err (!%p450_p4)
}
   0xb   :  { %17 = dma.hbm_to_vmem [thread:$0]  %s538_s0, 128, %s15_s7, [#allocation3]  }
   0xc   :  { %474 = dma.done.wait [#allocation3], 128  }
   0xd   :  { %475 = vsyncadd [#allocation3], 4294967168  ;;  %v23_v0 = vlaneseq  ;;  %vm52_vm1 = vcmask 261120   ;;  %v40_v2 = vld [vmem:[#allocation2] sm:$0xff]  ;;  %v479_v9 = vmov 0.0   ;;  %s482_s0 = smov [#allocation5]  }
   0xe   :  { %403 = vmatprep.subr.bf16.mxu1 %v479_v9  ;;  %343 = vst [vmem:[#allocation5 + $0x8] sm:$0xff] %v479_v9  ;;  %395 = vmatprep.subr.bf16.mxu0 %v479_v9  ;;  %v480_v12 = vmov 1.0|1.0   ;;  %s350_s11 = sshll.u32 %s482_s0, 4  ;;  %s351_s11 = int_to_ptr.vmem [resolvable:$true] %s350_s11 }
   0xf   :  { %v24_v1 = vand.u32 127, %v23_v0  ;;  %v34_v5 = vshrl.u32 %v23_v0, 7  ;;  %s454_s12 = scalar_lea.vmem %s351_s11, 256  ;;  %p459_p6 = scmp.lt.s32.totalorder %s351_s11, %s351_s11 }
  0x10   :  { %p455_p5 = scmp.ne.s32.totalorder %s351_s11, %s454_s12  ;;  %p460_p7 = scmp.lt.s32.totalorder %s454_s12, %s454_s12 }
  0x11   :  { %vm43_vm0 = vcmp.lt.s32.totalorder %v24_v1, 32  ;;  %v29_v6 = vadd.s32 20, %v24_v1  ;;  %v36_v7 = vadd.s32 16, %v34_v5  ;;  %v37_v8 = vadd.s32 24, %v34_v5 }
  0x12   :  { %v51_v3 = vsel %vm43_vm0, %v40_v2, 0.0  ;;  %vm31_vm6 = vcmp.lt.s32.totalorder %v24_v1, 13  ;;  %v35_v10 = vadd.s32 8, %v34_v5  ;;  %vm66_vm12 = vcmp.ge.s32.totalorder %v34_v5, %v24_v1  ;;  %p461_p8 = por %p460_p7, %p459_p6 }
  0x13   :  { %v53_v4 = vsel %vm52_vm1, %v51_v3, 0.0  ;;  %vm70_vm2 = vcmp.ge.s32.totalorder %v36_v7, %v24_v1  ;;  %vm72_vm3 = vcmp.ge.s32.totalorder %v37_v8, %v24_v1  ;;  %vm78_vm4 = vcmp.lt.s32.totalorder %v36_v7, %v29_v6  ;;  %vm94_vm14 = vmand %vm66_vm12, %vm31_vm6 }
  0x14   :  { %54 = vadd.xlane.f32.xlu0 %v53_v4  ;;  %vm80_vm5 = vcmp.lt.s32.totalorder %v37_v8, %v29_v6  ;;  %vm86_vm7 = vmand %vm70_vm2, %vm78_vm4  ;;  %vm68_vm13 = vcmp.ge.s32.totalorder %v35_v10, %v24_v1  ;;  %p462_p9 = pnand %p461_p8, %p455_p5 }
  0x15   :  { %vm88_vm8 = vmand %vm72_vm3, %vm80_vm5  ;;  %vm481_vm3 = vmmov 0  }
  0x16   :  { %vm98_vm9 = vmand %vm86_vm7, %vm31_vm6  ;;  %407 = vmatprep.mubr.msk.bf16.mxu1 %vm481_vm3, %v479_v9  ;;  %399 = vmatprep.mubr.msk.bf16.mxu0 %vm481_vm3, %v479_v9 }
  0x17   :  { %vm100_vm10 = vmand %vm88_vm8, %vm31_vm6 }
  0x18   :  { %vm500_vm11 = vmpackc.low %vm100_vm10, %vm98_vm9 }
  0x19   :  { %404 = vmatpush3.bf16.msk.msra.mxu1 %vm500_vm11, %v480_v12  ;;  %396 = vmatpush3.bf16.msk.msra.mxu0 %vm500_vm11, %v480_v12  ;;  %vm96_vm15 = vmand %vm68_vm13, %vm31_vm6 }
  0x1a   :  { %405 = vmatprep.subr.bf16.mxu1 %v479_v9  ;;  %397 = vmatprep.subr.bf16.mxu0 %v479_v9  ;;  %vm510_vm2 = vmpackc.low %vm96_vm15, %vm94_vm14 }
  0x1d   :  { %406 = vmatpush3.bf16.msk.msra.mxu1 %vm510_vm2, %v480_v12  ;;  %398 = vmatpush3.bf16.msk.msra.mxu0 %vm510_vm2, %v480_v12 }
  0x1e   :  { %419 = vmatprep.subr.bf16.mxu1 %v479_v9  ;;  %411 = vmatprep.subr.bf16.mxu0 %v479_v9 }
  0x9d   :  { %v55_v14 = vpop.xlane.xlu0 %54 }
  0x9e   :  { %v59_v15 = vmul.f32 0.03125, %v55_v14 }
  0xa0   :  { %v60_v16 = vsub.f32 %v40_v2, %v59_v15 }
  0xa2   :  { %v61_v17 = vsel %vm43_vm0, %v60_v16, 0.0 }
  0xa3   :  { %v133_v18 = vpack.c.bf16 %v61_v17, %v61_v17  ;;  %v137_v19 = vmul.f32 %v61_v17, %v61_v17 }
  0xa5   :  { %v134_v20 = vunpack.c.l.bf16 %v133_v18  ;;  %v138_v21 = vpack.c.bf16 %v137_v19, %v137_v19  ;;  %408 = vmatmul.mubr.msk.bf16.vlgmr.msra.gmra.mxu1 %vm52_vm1, %v133_v18 }
  0xa6   :  { %420 = vmatpush3.bf16.msk.msra.mxu1 %vm500_vm11, %v480_v12  ;;  %423 = vmatprep.mubr.msk.bf16.mxu1 %vm481_vm3, %v479_v9 }
  0xa7   :  { %v135_v22 = vsub.f32 %v61_v17, %v134_v20  ;;  %421 = vmatprep.subr.bf16.mxu1 %v479_v9  ;;  %v139_v24 = vunpack.c.l.bf16 %v138_v21 }
  0xa9   :  { %v136_v23 = vpack.c.bf16 %v135_v22, %v135_v22  ;;  %v140_v25 = vsub.f32 %v137_v19, %v139_v24 }
  0xaa   :  { %422 = vmatpush3.bf16.msk.msra.mxu1 %vm510_vm2, %v480_v12 }
  0xab   :  { %400 = vmatmul.mubr.msk.bf16.vlgmr.msra.gmra.mxu0 %vm52_vm1, %v136_v23  ;;  %v141_v26 = vpack.c.bf16 %v140_v25, %v140_v25 }
  0xac   :  { %412 = vmatpush3.bf16.msk.msra.mxu0 %vm500_vm11, %v480_v12  ;;  %415 = vmatprep.mubr.msk.bf16.mxu0 %vm481_vm3, %v479_v9 }
  0xad   :  { %424 = vmatmul.mubr.msk.bf16.vlgmr.msra.gmra.mxu1 %vm52_vm1, %v138_v21  ;;  %413 = vmatprep.subr.bf16.mxu0 %v479_v9 }
  0xb0   :  { %414 = vmatpush3.bf16.msk.msra.mxu0 %vm510_vm2, %v480_v12 }
  0xb3   :  { %416 = vmatmul.mubr.msk.bf16.vlgmr.msra.gmra.mxu0 %vm52_vm1, %v141_v26 }
 0x165   :  { %v223_v27 = vpop.f32.mrf.mxu1 }
 0x167   :  { %v409_v28 = vpop.f32.mrf.mxu1 }
 0x169   :  { %v227_v29 = vpop.f32.mrf.mxu1 }
 0x16b   :  { %v179_v30 = vpop.f32.mrf.mxu0  ;;  %v410_v31 = vpop.f32.mrf.mxu1 }
 0x16c   :  { %v224_v32 = vadd.f32 %v223_v27, %v179_v30 }
 0x16d   :  { %v401_v33 = vpop.f32.mrf.mxu0  ;;  %v311_v34 = vpop.f32.mrf.mxu1 }
 0x16e   :  { %v318_v37 = vmul.f32 %v224_v32, %v224_v32 }
 0x16f   :  { %v183_v35 = vpop.f32.mrf.mxu0  ;;  %v425_v36 = vpop.f32.mrf.mxu1 }
 0x170   :  { %v320_v42 = vmul.f32 0.05, %v318_v37 }
 0x171   :  { %v402_v38 = vpop.f32.mrf.mxu0  ;;  %v315_v39 = vpop.f32.mrf.mxu1 }
 0x173   :  { %v267_v40 = vpop.f32.mrf.mxu0  ;;  %v426_v41 = vpop.f32.mrf.mxu1 }
 0x174   :  { %v312_v43 = vadd.f32 %v311_v34, %v267_v40 }
 0x175   :  { %v417_v44 = vpop.f32.mrf.mxu0 }
 0x176   :  { %v322_v45 = vsub.f32 %v312_v43, %v320_v42 }
 0x177   :  { %v271_v46 = vpop.f32.mrf.mxu0 }
 0x178   :  { %v324_v47 = vmul.f32 0.05263158, %v322_v45 }
 0x179   :  { %v418_v48 = vpop.f32.mrf.mxu0 }
 0x17a   :  { %v326_v49 = vmax.f32 %v324_v47, 0.0 }
 0x17c   :  { %432 = vrsqrt.f32 %v326_v49  ;;  %vm330_vm0 = vcmp.eq.f32.partialorder %v326_v49, inf  ;;  %v333_v52 = vand.u32 2147483648, %v326_v49  ;;  %vm332_vm1 = vcmp.eq.f32.partialorder %v326_v49, 0.0 }
 0x189   :  { %v433_v50 = vpop.eup %432 }
 0x18a   :  { %v329_v51 = vmul.f32 %v433_v50, %v326_v49 }
 0x18c   :  { %v331_v53 = vsel %vm330_vm0, %v326_v49, %v329_v51 }
 0x18d   :  { %v334_v54 = vsel %vm332_vm1, %v333_v52, %v331_v53 }
 0x18e   :  { %342 = vst [vmem:[#allocation5] sm:$0xff] %v334_v54 }
 0x18f   :  { %465 = shalt.err (!%p462_p9)
}
 0x190   :  { %353 = dma.vmem_to_hbm [thread:$0]  %s351_s11, 256, %s539_s1, [#allocation4]  }
 0x191   :  { %476 = dma.done.wait [#allocation4], 256  }
 0x192   :  { %477 = vsyncadd [#allocation4], 4294967040 }
 0x193   :  { %357 = vsyncpa [#allocation3], 1 }
 0x194   :  { %358 = vsyncpa [#allocation4], 1 }

</bundles_post_ra>
